<compile_context>
chip_gen: v7x
topology: tpu7x:2x2x1
jax: 0.10.0
libtpu: 0.0.40
codegen_flags: <defaults>
</compile_context>

<pallas_src>
import math
import numpy as np
import jax
import jax.numpy as jnp
from jax.experimental import pallas as pl
from jax.experimental.pallas import tpu as pltpu


def _banded_conv1d_weight(w, lin):
    """Dense banded matrix for a stride-1 'same'-padded Conv1d.

    w: (Cout, Cin, K) PyTorch conv weight.  Returns W_big of shape
    (lin*Cout, lin*Cin) such that, for a time-major flattened input column
    x_col[m*Cin + c] = x[c, m],

        y[l*Cout + o] = sum_{m,c} W_big[l*Cout + o, m*Cin + c] * x_col[m*Cin + c]
                      = sum_{k,c} w[o, c, k] * x[c, l + k - left]   (zero-padded)

    exactly matching torch's cross-correlation with padding='same'.
    """
    cout, cin, k = w.shape
    left = (k - 1) // 2
    l = jnp.arange(lin)
    m = jnp.arange(lin)
    tap = m[None, :] - l[:, None] + left                     # (lin, lin)
    valid = ((tap >= 0) & (tap < k)).astype(jnp.float32)
    tap_c = jnp.clip(tap, 0, k - 1)
    w_t = jnp.transpose(w, (2, 0, 1)).astype(jnp.float32)    # (K, Cout, Cin)
    blocks = w_t[tap_c] * valid[:, :, None, None]            # (lin, lin, Cout, Cin)
    return jnp.transpose(blocks, (0, 2, 1, 3)).reshape(lin * cout, lin * cin)


def make_net_kernel(BB, L, Cin, C1, C2, C3):
    """Fused forward kernel for one block of BB samples (batch on lanes)."""
    L1, L2, L3, Lf = L, L // 2, L // 4, L // 8

    def pool2(h, lin, c):
        # max_pool1d(kernel_size=2) over the time axis of an (lin*c, BB) slab
        # (row = time*c + channel).  c is a multiple of 8, so both sublane
        # slices are tile-aligned -> plain vector maxes, no masks.
        v = h.reshape(lin // 2, 2 * c, BB)
        return jnp.maximum(v[:, :c, :], v[:, c:, :]).reshape((lin // 2) * c, BB)

    def conv(w_ref, b_ref, x):
        # One banded matmul per conv: (Lout*Cout, Lin*Cin) @ (Lin*Cin, BB).
        # 'same' zero padding is baked into w_ref; accumulate in f32.
        return jnp.dot(w_ref[...], x.astype(w_ref.dtype),
                       preferred_element_type=jnp.float32) + b_ref[...]

    def kernel(x_ref, w1_ref, b1_ref, w2_ref, b2_ref, w3_ref, b3_ref,
               wfc_ref, out_ref):
        h1 = conv(w1_ref, b1_ref, x_ref[...])        # (L1*C1, BB)
        p1 = pool2(h1, L1, C1)                        # (L2*C1, BB)
        h2 = conv(w2_ref, b2_ref, p1)                 # (L2*C2, BB)
        p2 = pool2(h2, L2, C2)                        # (L3*C2, BB)
        h3 = conv(w3_ref, b3_ref, p2)                 # (L3*C3, BB)
        p3 = pool2(h3, L3, C3)                        # (Lf*C3, BB)
        # fc2 (bias=False): (1, Lf*C3) @ (Lf*C3, BB) -> lane-dense (1, BB).
        out_ref[0] = jnp.dot(wfc_ref[...], p3.astype(wfc_ref.dtype),
                             preferred_element_type=jnp.float32)

    return kernel


def net_forward_pallas(x_ncw, params, *, block_batch=128,
                       matmul_dtype=jnp.float32):
    """params use PyTorch layouts: conv w (Cout, Cin, K), conv b (Cout,),
    fc w (1, Cout3 * (win_len // 8))."""
    (w1, b1, w2, b2, w3, b3, wfc) = params
    B, Cin, L = x_ncw.shape
    C1, _, K1 = w1.shape
    C2, _, K2 = w2.shape
    C3, _, K3 = w3.shape
    if L % 8 != 0:
        # round(win_len/8) in the original module only equals three floor-halvings
        # when win_len % 8 == 0; require that here.
        raise ValueError("win_len must be a multiple of 8")
    L1, L2, L3, Lf = L, L // 2, L // 4, L // 8

    BB = block_batch
    assert BB % 128 == 0, "block_batch must be a multiple of 128 (batch on lanes)"
    G = -(-B // BB)
    padded_B = G * BB

    # Stage the input lane-dense: (B, Cin, L) -> per-block (L*Cin, BB) slabs
    # with the batch block on the 128-wide lane axis, (time, channel) on sublanes.
    x_rows = jnp.transpose(x_ncw, (0, 2, 1)).reshape(B, L * Cin).astype(jnp.float32)
    if padded_B != B:
        x_rows = jnp.concatenate(
            [x_rows, jnp.zeros((padded_B - B, L * Cin), jnp.float32)], axis=0)
    x_staged = (jnp.transpose(x_rows.reshape(G, BB, L * Cin), (0, 2, 1))
                .reshape(G * L * Cin, BB).astype(matmul_dtype))

    # Banded conv weights ('same' zero padding folded in -> no in-kernel halos).
    w1b = _banded_conv1d_weight(w1, L1).astype(matmul_dtype)   # (L1*C1, L1*Cin)
    w2b = _banded_conv1d_weight(w2, L2).astype(matmul_dtype)   # (L2*C2, L2*C1)
    w3b = _banded_conv1d_weight(w3, L3).astype(matmul_dtype)   # (L3*C3, L3*C2)
    b1c = jnp.tile(b1.astype(jnp.float32), L1).reshape(L1 * C1, 1)
    b2c = jnp.tile(b2.astype(jnp.float32), L2).reshape(L2 * C2, 1)
    b3c = jnp.tile(b3.astype(jnp.float32), L3).reshape(L3 * C3, 1)
    # torch flattens (B, C3, Lf) as c*Lf + l; the kernel's p3 rows are l*C3 + c.
    wfc_row = wfc.reshape(C3, Lf).T.reshape(1, Lf * C3).astype(matmul_dtype)

    kernel = make_net_kernel(BB, L, Cin, C1, C2, C3)
    out = pl.pallas_call(
        kernel,
        out_shape=jax.ShapeDtypeStruct((G, 1, BB), jnp.float32),
        grid_spec=pltpu.PrefetchScalarGridSpec(
            num_scalar_prefetch=0,
            grid=(G,),
            in_specs=[
                pl.BlockSpec((L * Cin, BB), lambda g: (g, 0)),   # input block (lane-dense)
                pl.BlockSpec(w1b.shape, lambda g: (0, 0)),       # conv1 banded weight
                pl.BlockSpec(b1c.shape, lambda g: (0, 0)),       # conv1 bias column
                pl.BlockSpec(w2b.shape, lambda g: (0, 0)),       # conv2 banded weight
                pl.BlockSpec(b2c.shape, lambda g: (0, 0)),       # conv2 bias column
                pl.BlockSpec(w3b.shape, lambda g: (0, 0)),       # conv3 banded weight
                pl.BlockSpec(b3c.shape, lambda g: (0, 0)),       # conv3 bias column
                pl.BlockSpec(wfc_row.shape, lambda g: (0, 0)),   # fc weight row
            ],
            out_specs=pl.BlockSpec((1, 1, BB), lambda g: (g, 0, 0)),
        ),
        compiler_params=pltpu.CompilerParams(
            dimension_semantics=("parallel",)),
    )(x_staged, w1b, b1c, w2b, b2c, w3b, b3c, wfc_row)
    return out.reshape(padded_B)[:B].reshape(B, 1)


def net_forward_ref(x_ncw, params):
    """Pure-JAX reference mirroring the PyTorch forward exactly."""
    (w1, b1, w2, b2, w3, b3, wfc) = params

    def conv_same(x, w, b):
        K = w.shape[2]
        left = (K - 1) // 2
        right = (K - 1) - left
        y = jax.lax.conv_general_dilated(
            x, w, window_strides=(1,), padding=[(left, right)],
            dimension_numbers=("NCH", "OIH", "NCH"))
        return y + b[None, :, None]

    def maxpool2(x):
        return jax.lax.reduce_window(
            x, -jnp.inf, jax.lax.max,
            window_dimensions=(1, 1, 2), window_strides=(1, 1, 2),
            padding="VALID")

    y = maxpool2(conv_same(x_ncw, w1, b1))
    y = maxpool2(conv_same(y, w2, b2))
    y = maxpool2(conv_same(y, w3, b3))
    flat = y.reshape(y.shape[0], -1)   # matches torch x.view(-1, C*L)
    return flat @ wfc.T


def xavier_uniform(key, shape):
    # shape = (Cout, Cin, K), matching nn.init.xavier_uniform on conv weights.
    cout, cin, k = shape
    bound = math.sqrt(6.0 / (cin * k + cout * k))
    return jax.random.uniform(key, shape, jnp.float32, -bound, bound)


if __name__ == "__main__":
    # Module-consistent hyperparameters (small shapes).
    feat_len, win_len = 4, 16
    conv1_ch_mul, K1 = 2, 3
    conv2_ch_mul, K2 = 2, 3
    conv3_ch_mul, K3 = 2, 5
    B = 130                                  # -> 2 grid blocks of 128 (exercises padding + both v7x cores)
    C1 = feat_len * conv1_ch_mul             # 8
    C2 = C1 * conv2_ch_mul                   # 16
    C3 = C2 * conv3_ch_mul                   # 32
    Lf = win_len // 8                        # 2
    flatten_width = C3 * Lf                  # 64

    key = jax.random.PRNGKey(0)
    ks = jax.random.split(key, 8)
    w1 = xavier_uniform(ks[0], (C1, feat_len, K1))
    b1 = jax.random.uniform(ks[1], (C1,), jnp.float32,
                            -1.0 / math.sqrt(feat_len * K1), 1.0 / math.sqrt(feat_len * K1))
    w2 = xavier_uniform(ks[2], (C2, C1, K2))
    b2 = jax.random.uniform(ks[3], (C2,), jnp.float32,
                            -1.0 / math.sqrt(C1 * K2), 1.0 / math.sqrt(C1 * K2))
    w3 = xavier_uniform(ks[4], (C3, C2, K3))
    b3 = jax.random.uniform(ks[5], (C3,), jnp.float32,
                            -1.0 / math.sqrt(C2 * K3), 1.0 / math.sqrt(C2 * K3))
    wfc = jax.random.uniform(ks[6], (1, flatten_width), jnp.float32,
                             -1.0 / math.sqrt(flatten_width), 1.0 / math.sqrt(flatten_width))
    x = jax.random.normal(ks[7], (B, feat_len, win_len), jnp.float32)

    params = (w1, b1, w2, b2, w3, b3, wfc)
    out = net_forward_pallas(x, params)
    out = jax.block_until_ready(out)

    ref = net_forward_ref(x, params)
    np.testing.assert_allclose(np.asarray(out), np.asarray(ref), rtol=1e-3, atol=1e-3)
    print("KERNEL_OK")
</pallas_src>

<mosaic_0001>
module attributes {stable_mosaic.version = 11 : i64} {
  func.func @kernel(%arg0: i32, %arg1: memref<64x128xf32, #tpu.memory_space<vmem>>, %arg2: memref<128x64xf32, #tpu.memory_space<vmem>>, %arg3: memref<128x1xf32, #tpu.memory_space<vmem>>, %arg4: memref<128x64xf32, #tpu.memory_space<vmem>>, %arg5: memref<128x1xf32, #tpu.memory_space<vmem>>, %arg6: memref<128x64xf32, #tpu.memory_space<vmem>>, %arg7: memref<128x1xf32, #tpu.memory_space<vmem>>, %arg8: memref<1x64xf32, #tpu.memory_space<vmem>>, %arg9: memref<1x1x128xf32, #tpu.memory_space<vmem>>) attributes {dimension_semantics = [#tpu.dimension_semantics<parallel>], iteration_bounds = array<i64: 2>, scalar_prefetch = 0 : i64, scratch_operands = 0 : i64, tpu.core_type = #tpu.core_type<tc>, window_params = [{transform_indices = @transform_0, window_bounds = array<i64: 64, 128>}, {pipeline_mode = #tpu.pipeline_mode<synchronous>, transform_indices = @transform_1, window_bounds = array<i64: 128, 64>}, {pipeline_mode = #tpu.pipeline_mode<synchronous>, transform_indices = @transform_2, window_bounds = array<i64: 128, 1>}, {pipeline_mode = #tpu.pipeline_mode<synchronous>, transform_indices = @transform_3, window_bounds = array<i64: 128, 64>}, {pipeline_mode = #tpu.pipeline_mode<synchronous>, transform_indices = @transform_4, window_bounds = array<i64: 128, 1>}, {pipeline_mode = #tpu.pipeline_mode<synchronous>, transform_indices = @transform_5, window_bounds = array<i64: 128, 64>}, {pipeline_mode = #tpu.pipeline_mode<synchronous>, transform_indices = @transform_6, window_bounds = array<i64: 128, 1>}, {pipeline_mode = #tpu.pipeline_mode<synchronous>, transform_indices = @transform_7, window_bounds = array<i64: 1, 64>}, {transform_indices = @transform_8, window_bounds = array<i64: 1, 1, 128>}]} {
    %c0 = arith.constant 0 : index
    %c0_0 = arith.constant 0 : index
    %0 = vector.load %arg1[%c0, %c0_0] : memref<64x128xf32, #tpu.memory_space<vmem>>, vector<64x128xf32>
    %c0_1 = arith.constant 0 : index
    %c0_2 = arith.constant 0 : index
    %1 = vector.load %arg2[%c0_1, %c0_2] : memref<128x64xf32, #tpu.memory_space<vmem>>, vector<128x64xf32>
    %cst = arith.constant dense<0.000000e+00> : vector<128x128xf32>
    %2 = tpu.matmul %1, %0, %cst {dimension_numbers = #tpu.dot_dimension_numbers<[1], [0], [0], [1], [0, 0, 1, 1], [], []>} : vector<128x64xf32>, vector<64x128xf32>, vector<128x128xf32> -> vector<128x128xf32>
    %c0_3 = arith.constant 0 : index
    %c0_4 = arith.constant 0 : index
    %3 = vector.load %arg3[%c0_3, %c0_4] : memref<128x1xf32, #tpu.memory_space<vmem>>, vector<128x1xf32>
    %4 = vector.broadcast %3 : vector<128x1xf32> to vector<128x128xf32>
    %5 = arith.addf %2, %4 : vector<128x128xf32>
    %6 = vector.shape_cast %5 : vector<128x128xf32> to vector<8x16x128xf32>
    %7 = vector.extract_strided_slice %6 {offsets = [0, 0, 0], sizes = [8, 8, 128], strides = [1, 1, 1]} : vector<8x16x128xf32> to vector<8x8x128xf32>
    %8 = vector.extract_strided_slice %6 {offsets = [0, 8, 0], sizes = [8, 8, 128], strides = [1, 1, 1]} : vector<8x16x128xf32> to vector<8x8x128xf32>
    %9 = arith.maximumf %7, %8 : vector<8x8x128xf32>
    %10 = vector.shape_cast %9 : vector<8x8x128xf32> to vector<64x128xf32>
    %c0_5 = arith.constant 0 : index
    %c0_6 = arith.constant 0 : index
    %11 = vector.load %arg4[%c0_5, %c0_6] : memref<128x64xf32, #tpu.memory_space<vmem>>, vector<128x64xf32>
    %cst_7 = arith.constant dense<0.000000e+00> : vector<128x128xf32>
    %12 = tpu.matmul %11, %10, %cst_7 {dimension_numbers = #tpu.dot_dimension_numbers<[1], [0], [0], [1], [0, 0, 1, 1], [], []>} : vector<128x64xf32>, vector<64x128xf32>, vector<128x128xf32> -> vector<128x128xf32>
    %c0_8 = arith.constant 0 : index
    %c0_9 = arith.constant 0 : index
    %13 = vector.load %arg5[%c0_8, %c0_9] : memref<128x1xf32, #tpu.memory_space<vmem>>, vector<128x1xf32>
    %14 = vector.broadcast %13 : vector<128x1xf32> to vector<128x128xf32>
    %15 = arith.addf %12, %14 : vector<128x128xf32>
    %16 = vector.shape_cast %15 : vector<128x128xf32> to vector<4x32x128xf32>
    %17 = vector.extract_strided_slice %16 {offsets = [0, 0, 0], sizes = [4, 16, 128], strides = [1, 1, 1]} : vector<4x32x128xf32> to vector<4x16x128xf32>
    %18 = vector.extract_strided_slice %16 {offsets = [0, 16, 0], sizes = [4, 16, 128], strides = [1, 1, 1]} : vector<4x32x128xf32> to vector<4x16x128xf32>
    %19 = arith.maximumf %17, %18 : vector<4x16x128xf32>
    %20 = vector.shape_cast %19 : vector<4x16x128xf32> to vector<64x128xf32>
    %c0_10 = arith.constant 0 : index
    %c0_11 = arith.constant 0 : index
    %21 = vector.load %arg6[%c0_10, %c0_11] : memref<128x64xf32, #tpu.memory_space<vmem>>, vector<128x64xf32>
    %cst_12 = arith.constant dense<0.000000e+00> : vector<128x128xf32>
    %22 = tpu.matmul %21, %20, %cst_12 {dimension_numbers = #tpu.dot_dimension_numbers<[1], [0], [0], [1], [0, 0, 1, 1], [], []>} : vector<128x64xf32>, vector<64x128xf32>, vector<128x128xf32> -> vector<128x128xf32>
    %c0_13 = arith.constant 0 : index
    %c0_14 = arith.constant 0 : index
    %23 = vector.load %arg7[%c0_13, %c0_14] : memref<128x1xf32, #tpu.memory_space<vmem>>, vector<128x1xf32>
    %24 = vector.broadcast %23 : vector<128x1xf32> to vector<128x128xf32>
    %25 = arith.addf %22, %24 : vector<128x128xf32>
    %26 = vector.shape_cast %25 : vector<128x128xf32> to vector<2x64x128xf32>
    %27 = vector.extract_strided_slice %26 {offsets = [0, 0, 0], sizes = [2, 32, 128], strides = [1, 1, 1]} : vector<2x64x128xf32> to vector<2x32x128xf32>
    %28 = vector.extract_strided_slice %26 {offsets = [0, 32, 0], sizes = [2, 32, 128], strides = [1, 1, 1]} : vector<2x64x128xf32> to vector<2x32x128xf32>
    %29 = arith.maximumf %27, %28 : vector<2x32x128xf32>
    %30 = vector.shape_cast %29 : vector<2x32x128xf32> to vector<64x128xf32>
    %c0_15 = arith.constant 0 : index
    %c0_16 = arith.constant 0 : index
    %31 = vector.load %arg8[%c0_15, %c0_16] : memref<1x64xf32, #tpu.memory_space<vmem>>, vector<1x64xf32>
    %cst_17 = arith.constant dense<0.000000e+00> : vector<1x128xf32>
    %32 = tpu.matmul %31, %30, %cst_17 {dimension_numbers = #tpu.dot_dimension_numbers<[1], [0], [0], [1], [0, 0, 1, 1], [], []>} : vector<1x64xf32>, vector<64x128xf32>, vector<1x128xf32> -> vector<1x128xf32>
    %c0_18 = arith.constant 0 : index
    %c0_19 = arith.constant 0 : index
    %c0_20 = arith.constant 0 : index
    %33 = vector.load %arg9[%c0_18, %c0_19, %c0_20] : memref<1x1x128xf32, #tpu.memory_space<vmem>>, vector<1x1x128xf32>
    %34 = vector.shape_cast %33 : vector<1x1x128xf32> to vector<1x128xf32>
    %35 = vector.shape_cast %32 : vector<1x128xf32> to vector<1x1x128xf32>
    tpu.vector_store %arg9[%c0_18, %c0_19, %c0_20], %35 {strides = array<i32>} : memref<1x1x128xf32, #tpu.memory_space<vmem>>, vector<1x1x128xf32>,
    return
  }
  func.func @transform_0(%arg0: i32) -> (i32, i32) {
    %c0_i32 = arith.constant 0 : i32
    %c0_i32_0 = arith.constant 0 : i32
    return %arg0, %c0_i32 : i32, i32
  }
  func.func @transform_1(%arg0: i32) -> (i32, i32) {
    %c0_i32 = arith.constant 0 : i32
    %c0_i32_0 = arith.constant 0 : i32
    %c0_i32_1 = arith.constant 0 : i32
    return %c0_i32, %c0_i32_0 : i32, i32
  }
  func.func @transform_2(%arg0: i32) -> (i32, i32) {
    %c0_i32 = arith.constant 0 : i32
    %c0_i32_0 = arith.constant 0 : i32
    %c0_i32_1 = arith.constant 0 : i32
    return %c0_i32, %c0_i32_0 : i32, i32
  }
  func.func @transform_3(%arg0: i32) -> (i32, i32) {
    %c0_i32 = arith.constant 0 : i32
    %c0_i32_0 = arith.constant 0 : i32
    %c0_i32_1 = arith.constant 0 : i32
    return %c0_i32, %c0_i32_0 : i32, i32
  }
  func.func @transform_4(%arg0: i32) -> (i32, i32) {
    %c0_i32 = arith.constant 0 : i32
    %c0_i32_0 = arith.constant 0 : i32
    %c0_i32_1 = arith.constant 0 : i32
    return %c0_i32, %c0_i32_0 : i32, i32
  }
  func.func @transform_5(%arg0: i32) -> (i32, i32) {
    %c0_i32 = arith.constant 0 : i32
    %c0_i32_0 = arith.constant 0 : i32
    %c0_i32_1 = arith.constant 0 : i32
    return %c0_i32, %c0_i32_0 : i32, i32
  }
  func.func @transform_6(%arg0: i32) -> (i32, i32) {
    %c0_i32 = arith.constant 0 : i32
    %c0_i32_0 = arith.constant 0 : i32
    %c0_i32_1 = arith.constant 0 : i32
    return %c0_i32, %c0_i32_0 : i32, i32
  }
  func.func @transform_7(%arg0: i32) -> (i32, i32) {
    %c0_i32 = arith.constant 0 : i32
    %c0_i32_0 = arith.constant 0 : i32
    %c0_i32_1 = arith.constant 0 : i32
    return %c0_i32, %c0_i32_0 : i32, i32
  }
  func.func @transform_8(%arg0: i32) -> (i32, i32, i32) {
    %c0_i32 = arith.constant 0 : i32
    %c0_i32_0 = arith.constant 0 : i32
    %c0_i32_1 = arith.constant 0 : i32
    return %arg0, %c0_i32, %c0_i32_0 : i32, i32, i32
  }
}

</mosaic_0001>

<bundles_post_ra>
// kernel: tpu_custom_call.1
= control target key start
LH: loop header
LB: loop body
LE: loop exit
PB: predicated region body
PF: predicated region fallthrough
CT: control target
= control target key end

     0   :  { %13 = vsyncpa [#allocation3], 0  ;;  %s2344_s0 = inlined_call_operand.vmem [shape: f32[128,128], index: 0, kind: input, shape index: {}]   ;;  %s2345_s1 = inlined_call_operand.vmem [shape: f32[128,64], index: 1, kind: input, shape index: {}]   ;;  %s2346_s2 = inlined_call_operand.vmem [shape: f32[128,1], index: 2, kind: input, shape index: {}]   ;;  %s2347_s3 = inlined_call_operand.vmem [shape: f32[128,64], index: 3, kind: input, shape index: {}]   ;;  %s2348_s4 = inlined_call_operand.vmem [shape: f32[128,1], index: 4, kind: input, shape index: {}]   ;;  %s2349_s5 = inlined_call_operand.vmem [shape: f32[128,64], index: 5, kind: input, shape index: {}]   ;;  %s2350_s6 = inlined_call_operand.vmem [shape: f32[128,1], index: 6, kind: input, shape index: {}]   ;;  %s2351_s7 = inlined_call_operand.vmem [shape: f32[1,64], index: 7, kind: input, shape index: {}]   ;;  %s2352_s8 = inlined_call_operand.hbm [shape: f32[2,1,128], index: 8, kind: output, shape index: {}]  }
   0x1   :  { %15 = vsyncpa [#allocation3 + $0x1], 0  ;;  %s1901_s27 = smov 0   ;;  %s1903_s28 = smov 0  }
   0x2   :  { %s1905_s29 = smov 0   ;;  %s1907_s30 = smov 0  }
   0x3 LB: > { %s1922_s9 = sadd.s32 4294967295, %s1849_s30   ;;  %s1396_s10 = sadd.s32 4294967294, %s1849_s30   ;;  %s1849_s30 = sphi %s1907_s30, %s2358_s30   ;;  %s1845_s29 = sphi %s1905_s29, %s2357_s29   ;;  %s1841_s28 = sphi %s1903_s28, %s2356_s28   ;;  %s1837_s27 = sphi %s1901_s27, %s2355_s27  }
   0x4   : > { %s1926_s11 = sadd.s32 1, %s1849_s30   ;;  %s201_s12 = sadd.s32 1, %s1845_s29 }
   0x5   : > { %s198_s13 = ssub.s32 %s1849_s30, %s1926_s11  ;;  %p211_p0 = scmp.ne.s32.totalorder %s1845_s29, %s1841_s28 }
   0x6   : > { %p199_p1 = scmp.eq.s32.totalorder %s198_s13, 0  ;;  %p212_p2 = scmp.eq.s32.totalorder %s1922_s9, 1 }
   0x7   : > { %p217_p3 = scmp.ne.s32.totalorder %s1841_s28, %s1837_s27  ;;  %p218_p4 = scmp.eq.s32.totalorder %s1396_s10, 1 }
   0x8   : > { %s1937_s14 = scalar_select %p199_p1, %s1845_s29, %s201_s12  }
   0x9   : > { %p1939_p5 = por %p212_p2, %p211_p0  ;;  %p1943_p6 = por %p218_p4, %p217_p3 }
   0xa   : > { %p1399_p7 = scmp.ge.s32.totalorder %s1849_s30, 1  ;;  %p266_p8 = scmp.lt.s32.totalorder %s1849_s30, 3 }
   0xc   : > { %p267_p9 = pnand %p1399_p7, %p266_p8 }
   0xd   : > { %s1400_s17 = sshll.u32 (!%p267_p9), %s1922_s9, 3  ;;  %v331_v0 = vld [vmem:[%s2346_s2 + $0x10] sm:$0xff] (!%p267_p9)  ;;  %v329_v1 = vld [vmem:[%s2346_s2] sm:$0xff] (!%p267_p9)  ;;  %vm425_vm0 = vcmask (!%p267_p9), 523264   ;;  %v1851_v2 = vmov (!%p267_p9), 0   ;;  %v332_v4 = vld [vmem:[%s2346_s2 + $0x18] sm:$0xff] (!%p267_p9) }
   0xe   : > { %270 = sbr.rel (%p267_p9) target bundleno = 1013 (0x3f5), region = 52  ;;  %1786 = vset.pattern.permute.xlu1 (!%p267_p9), %v1851_v2  ;;  %1785 = vset.pattern.permute.xlu0 (!%p267_p9), %v1851_v2  ;;  %p300_p10 = scmp.lt.s32.totalorder (!%p267_p9), %s1400_s17, 15  ;;  %v313_v3 = vld [vmem:[%s2345_s1] sm:$0xff] (!%p267_p9)  ;;  %v330_v5 = vld [vmem:[%s2346_s2 + $0x8] sm:$0xff] (!%p267_p9)  ;;  %v336_v20 = vld [vmem:[%s2346_s2 + $0x38] sm:$0xff] (!%p267_p9)  ;;  %vm1853_vm1 = vmmov (!%p267_p9), 0  }
   0xf   : > { %357 = vperm.xlu1 (!%p267_p9), %1786, %v331_v0   ;;  %347 = vperm.xlu0 (!%p267_p9), %1785, %v329_v1   ;;  %v321_v6 = vld [vmem:[%s2345_s1 + $0x40] sm:$0xff] (!%p267_p9)  ;;  %v334_v15 = vld [vmem:[%s2346_s2 + $0x28] sm:$0xff] (!%p267_p9)  ;;  %v335_v21 = vld [vmem:[%s2346_s2 + $0x30] sm:$0xff] (!%p267_p9)  ;;  %s297_s22 = sand.u32 (!%p267_p9), 1, %s1841_s28   ;;  %s1451_s24 = sshll.u32 (!%p267_p9), %s1922_s9, 4 }
  0x10   : > { %1551 = vmatprep.mubr.msk.f32.mxu0 (!%p267_p9), %vm425_vm0, %v313_v3  ;;  %1563 = vmatprep.mubr.msk.f32.mxu1 (!%p267_p9), %vm425_vm0, %v321_v6  ;;  %v333_v16 = vld [vmem:[%s2346_s2 + $0x20] sm:$0xff] (!%p267_p9)  ;;  %v338_v23 = vld [vmem:[%s2346_s2 + $0x48] sm:$0xff] (!%p267_p9)  ;;  %v340_v25 = vld [vmem:[%s2346_s2 + $0x58] sm:$0xff] (!%p267_p9)  ;;  %s298_s23 = scalar_lea.vmem (!%p267_p9), [#allocation2], %s297_s22  ;;  %s2304_s10 = scalar_lea.hbm (!%p267_p9), %s2352_s8, %s1451_s24 }
  0x11   : > { %v337_v24 = vld [vmem:[%s2346_s2 + $0x40] sm:$0xff] (!%p267_p9)  ;;  %v339_v26 = vld [vmem:[%s2346_s2 + $0x50] sm:$0xff] (!%p267_p9)  ;;  %v314_v27 = vld [vmem:[%s2345_s1 + $0x8] sm:$0xff] (!%p267_p9)  ;;  %s1329_s12 = scalar_lea.sflag (!%p267_p9), [#allocation3], %s297_s22  ;;  %s1855_s9 = smov (!%p267_p9), [#allocation2]  }
  0x12   : > { %v322_v28 = vld [vmem:[%s2345_s1 + $0x48] sm:$0xff] (!%p267_p9)  ;;  %v315_v29 = vld [vmem:[%s2345_s1 + $0x10] sm:$0xff] (!%p267_p9)  ;;  %v341_v32 = vld [vmem:[%s2346_s2 + $0x60] sm:$0xff] (!%p267_p9) }
  0x13   : > { %362 = vperm.xlu1 (!%p267_p9), %1786, %v332_v4   ;;  %352 = vperm.xlu0 (!%p267_p9), %1785, %v330_v5   ;;  %v323_v30 = vld [vmem:[%s2345_s1 + $0x50] sm:$0xff] (!%p267_p9)  ;;  %v342_v31 = vld [vmem:[%s2346_s2 + $0x68] sm:$0xff] (!%p267_p9)  ;;  %v316_v33 = vld [vmem:[%s2345_s1 + $0x18] sm:$0xff] (!%p267_p9) }
  0x14   : > { %v324_v34 = vld [vmem:[%s2345_s1 + $0x58] sm:$0xff] (!%p267_p9)  ;;  %v317_v35 = vld [vmem:[%s2345_s1 + $0x20] sm:$0xff] (!%p267_p9)  ;;  %v343_v38 = vld [vmem:[%s2346_s2 + $0x70] sm:$0xff] (!%p267_p9) }
  0x15   : > { %s2360_s17 = smov (!%p300_p10, %s1400_s17), 15  ;;  %v325_v36 = vld [vmem:[%s2345_s1 + $0x60] sm:$0xff]  ;;  %v344_v37 = vld [vmem:[%s2346_s2 + $0x78] sm:$0xff]  ;;  %v318_v39 = vld [vmem:[%s2345_s1 + $0x28] sm:$0xff] }
  0x16   : > { %s1401_s18 = sshll.u32 %s2360_s17, 3  ;;  %v326_v40 = vld [vmem:[%s2345_s1 + $0x68] sm:$0xff]  ;;  %v319_v41 = vld [vmem:[%s2345_s1 + $0x30] sm:$0xff]  ;;  %v643_v44 = vld [vmem:[%s2348_s4] sm:$0xff]  ;;  %s1341_s17 = sshll.u32 %s298_s23, 4  ;;  %s2299_s17 = int_to_ptr.vmem [resolvable:$true] %s1341_s17 }
  0x17   : > { %s303_s21 = scalar_lea.vmem %s2344_s0, %s1401_s18  ;;  %372 = vperm.xlu1 %1786, %v334_v15   ;;  %367 = vperm.xlu0 %1785, %v333_v16   ;;  %v327_v42 = vld [vmem:[%s2345_s1 + $0x70] sm:$0xff]  ;;  %v644_v43 = vld [vmem:[%s2348_s4 + $0x8] sm:$0xff]  ;;  %v320_v45 = vld [vmem:[%s2345_s1 + $0x38] sm:$0xff]  ;;  %s1787_s13 = scalar_lea.vmem %s2299_s17, 16 }
  0x18   : > { %v305_v7 = vld [vmem:[%s303_s21] sm:$0xff]  ;;  %v306_v8 = vld [vmem:[%s303_s21 + $0x8] sm:$0xff]  ;;  %v307_v9 = vld [vmem:[%s303_s21 + $0x10] sm:$0xff]  ;;  %p1788_p11 = scmp.ne.s32.totalorder %s2299_s17, %s1787_s13  ;;  %s1791_s18 = sshll.u32 %s1855_s9, 4  ;;  %s1792_s18 = int_to_ptr.vmem [resolvable:$false] %s1791_s18 }
  0x19   : > { %v1674_v10 = vpack.c.bf16 %v306_v8, %v305_v7  ;;  %v308_v11 = vld [vmem:[%s303_s21 + $0x18] sm:$0xff]  ;;  %v309_v13 = vld [vmem:[%s303_s21 + $0x20] sm:$0xff]  ;;  %v310_v14 = vld [vmem:[%s303_s21 + $0x28] sm:$0xff]  ;;  %s1793_s19 = scalar_lea.vmem %s1792_s18, 32  ;;  %p1794_p0 = scmp.lt.s32.totalorder %s2299_s17, %s1792_s18 }
  0x1a   : > { %v1678_v12 = vpack.c.bf16 %v308_v11, %v307_v9  ;;  %v1682_v17 = vpack.c.bf16 %v310_v14, %v309_v13  ;;  %v311_v18 = vld [vmem:[%s303_s21 + $0x30] sm:$0xff]  ;;  %v312_v19 = vld [vmem:[%s303_s21 + $0x38] sm:$0xff]  ;;  %v648_v49 = vld [vmem:[%s2348_s4 + $0x28] sm:$0xff]  ;;  %p1789_p12 = pnand %p1788_p11, %p1939_p5  ;;  %p1795_p1 = scmp.lt.s32.totalorder %s1793_s19, %s1787_s13 }
  0x1b   : > { %1675 = vmatprep.subr.bf16.mxu0 %v1674_v10  ;;  %1734 = vmatprep.subr.bf16.mxu1 %v1674_v10  ;;  %v1686_v22 = vpack.c.bf16 %v312_v19, %v311_v18  ;;  %v328_v46 = vld [vmem:[%s2345_s1 + $0x78] sm:$0xff]  ;;  %v645_v48 = vld [vmem:[%s2348_s4 + $0x10] sm:$0xff]  ;;  %v647_v50 = vld [vmem:[%s2348_s4 + $0x20] sm:$0xff] }
  0x1c   : > { %1677 = vmatpush3.bf16.msra.mxu0 %v1674_v10  ;;  %1738 = vmatpush3.bf16.msra.mxu1 %v1674_v10  ;;  %v646_v47 = vld [vmem:[%s2348_s4 + $0x18] sm:$0xff]  ;;  %v649_v52 = vld [vmem:[%s2348_s4 + $0x30] sm:$0xff]  ;;  %v652_v53 = vld [vmem:[%s2348_s4 + $0x48] sm:$0xff]  ;;  %p1790_p13 = pneg %p1789_p12  ;;  %p1796_p2 = por %p1795_p1, %p1794_p0 }
  0x1d   : > { %1679 = vmatprep.subr.bf16.mxu0 %v1678_v12  ;;  %1735 = vmatprep.subr.bf16.mxu1 %v1678_v12  ;;  %v650_v51 = vld [vmem:[%s2348_s4 + $0x38] sm:$0xff]  ;;  %v651_v54 = vld [vmem:[%s2348_s4 + $0x40] sm:$0xff]  ;;  %v653_v56 = vld [vmem:[%s2348_s4 + $0x50] sm:$0xff] }
  0x1e   : > { %382 = vperm.xlu1 %1786, %v336_v20   ;;  %377 = vperm.xlu0 %1785, %v335_v21   ;;  %v654_v55 = vld [vmem:[%s2348_s4 + $0x58] sm:$0xff]  ;;  %v656_v57 = vld [vmem:[%s2348_s4 + $0x68] sm:$0xff]  ;;  %v655_v58 = vld [vmem:[%s2348_s4 + $0x60] sm:$0xff]  ;;  %p1797_p3 = pnand %p1796_p2, %p1790_p13 }
  0x1f   : > { %v658_v59 = vld [vmem:[%s2348_s4 + $0x78] sm:$0xff]  ;;  %v657_v60 = vld [vmem:[%s2348_s4 + $0x70] sm:$0xff]  ;;  %v957_v61 = vld [vmem:[%s2350_s6 + $0x8] sm:$0xff] }
  0x20   : > { %1681 = vmatpush3.bf16.msra.mxu0 %v1678_v12  ;;  %1739 = vmatpush3.bf16.msra.mxu1 %v1678_v12  ;;  %v956_v62 = vld [vmem:[%s2350_s6] sm:$0xff]  ;;  %v961_v63 = vld [vmem:[%s2350_s6 + $0x28] sm:$0xff]  ;;  %v959_v1 = vld [vmem:[%s2350_s6 + $0x18] sm:$0xff] }
  0x21   : > { %1683 = vmatprep.subr.bf16.mxu0 %v1682_v17  ;;  %1736 = vmatprep.subr.bf16.mxu1 %v1682_v17  ;;  %v960_v0 = vld [vmem:[%s2350_s6 + $0x20] sm:$0xff]  ;;  %v958_v2 = vld [vmem:[%s2350_s6 + $0x10] sm:$0xff]  ;;  %v963_v3 = vld [vmem:[%s2350_s6 + $0x38] sm:$0xff] }
  0x22   : > { %392 = vperm.xlu1 %1786, %v338_v23   ;;  %387 = vperm.xlu0 %1785, %v337_v24   ;;  %v962_v4 = vld [vmem:[%s2350_s6 + $0x30] sm:$0xff]  ;;  %v965_v5 = vld [vmem:[%s2350_s6 + $0x48] sm:$0xff]  ;;  %v964_v6 = vld [vmem:[%s2350_s6 + $0x40] sm:$0xff] }
  0x23   : > { %v969_v7 = vld [vmem:[%s2350_s6 + $0x68] sm:$0xff]  ;;  %v968_v8 = vld [vmem:[%s2350_s6 + $0x60] sm:$0xff]  ;;  %v967_v9 = vld [vmem:[%s2350_s6 + $0x58] sm:$0xff] }
  0x24   : > { %1685 = vmatpush3.bf16.msra.mxu0 %v1682_v17  ;;  %1740 = vmatpush3.bf16.msra.mxu1 %v1682_v17  ;;  %v966_v10 = vld [vmem:[%s2350_s6 + $0x50] sm:$0xff]  ;;  %v971_v11 = vld [vmem:[%s2350_s6 + $0x78] sm:$0xff]  ;;  %v627_v13 = vld [vmem:[%s2347_s3] sm:$0xff] }
  0x25   : > { %1687 = vmatprep.subr.bf16.mxu0 %v1686_v22  ;;  %1737 = vmatprep.subr.bf16.mxu1 %v1686_v22  ;;  %v970_v12 = vld [vmem:[%s2350_s6 + $0x70] sm:$0xff] }
  0x26   : > { %402 = vperm.xlu1 %1786, %v340_v25   ;;  %397 = vperm.xlu0 %1785, %v339_v26  }
  0x28   : > { %1689 = vmatpush3.bf16.msra.mxu0 %v1686_v22  ;;  %1741 = vmatpush3.bf16.msra.mxu1 %v1686_v22 }
  0x2a   : > { %412 = vperm.xlu1 %1786, %v342_v31   ;;  %407 = vperm.xlu0 %1785, %v341_v32  }
  0x2b   : > { %1552 = vmatmul.mubr.msk.f32.vlgmr.msra.gmra.mrb[0].mxu0 %vm425_vm0, %v314_v27  ;;  %1564 = vmatmul.mubr.msk.f32.vlgmr.msra.gmra.mrb[0].mxu1 %vm425_vm0, %v322_v28 }
  0x2c   : > { %1554 = vmatprep.mubr.msk.f32.mxu0 %vm425_vm0, %v315_v29  ;;  %1566 = vmatprep.mubr.msk.f32.mxu1 %vm425_vm0, %v323_v30 }
  0x2e   : > { %422 = vperm.xlu1 %1786, %v344_v37   ;;  %417 = vperm.xlu0 %1785, %v343_v38  }
  0x2f   : > { %1555 = vmatmul.mubr.msk.f32.gmra.mrb[2].mxu0 %vm425_vm0, %v316_v33  ;;  %1567 = vmatmul.mubr.msk.f32.gmra.mrb[2].mxu1 %vm425_vm0, %v324_v34 }
  0x30   : > { %1557 = vmatprep.mubr.msk.f32.mxu0 %vm425_vm0, %v317_v35  ;;  %1569 = vmatprep.mubr.msk.f32.mxu1 %vm425_vm0, %v325_v36 }
  0x32   : > { %666 = vperm.xlu1 %1786, %v644_v43   ;;  %661 = vperm.xlu0 %1785, %v643_v44  }
  0x33   : > { %1558 = vmatmul.mubr.msk.f32.gmra.mrb[4].mxu0 %vm425_vm0, %v318_v39  ;;  %1570 = vmatmul.mubr.msk.f32.gmra.mrb[4].mxu1 %vm425_vm0, %v326_v40 }
  0x34   : > { %1560 = vmatprep.mubr.msk.f32.mxu0 %vm425_vm0, %v319_v41  ;;  %1572 = vmatprep.mubr.msk.f32.mxu1 %vm425_vm0, %v327_v42 }
  0x36   : > { %676 = vperm.xlu1 %1786, %v646_v47   ;;  %671 = vperm.xlu0 %1785, %v645_v48  }
  0x37   : > { %1561 = vmatmul.mubr.msk.f32.gmra.mrb[6].mxu0 %vm425_vm0, %v320_v45  ;;  %1573 = vmatmul.mubr.msk.f32.gmra.mrb[6].mxu1 %vm425_vm0, %v328_v46 }
  0x38   : > { %1591 = vmatprep.mubr.msk.f32.mxu1 %vm425_vm0, %v627_v13  ;;  %v631_v13 = vld [vmem:[%s2347_s3 + $0x20] sm:$0xff] }
  0x3a   : > { %686 = vperm.xlu1 %1786, %v648_v49   ;;  %681 = vperm.xlu0 %1785, %v647_v50  }
  0x3e   : > { %696 = vperm.xlu1 %1786, %v650_v51   ;;  %691 = vperm.xlu0 %1785, %v649_v52  }
  0x42   : > { %706 = vperm.xlu1 %1786, %v652_v53   ;;  %701 = vperm.xlu0 %1785, %v651_v54  }
  0x46   : > { %716 = vperm.xlu1 %1786, %v654_v55   ;;  %711 = vperm.xlu0 %1785, %v653_v56  }
  0x4a   : > { %726 = vperm.xlu1 %1786, %v656_v57   ;;  %721 = vperm.xlu0 %1785, %v655_v58  }
  0x4e   : > { %736 = vperm.xlu1 %1786, %v658_v59   ;;  %731 = vperm.xlu0 %1785, %v657_v60  }
  0x52   : > { %979 = vperm.xlu1 %1786, %v957_v61   ;;  %974 = vperm.xlu0 %1785, %v956_v62  }
  0x56   : > { %999 = vperm.xlu1 %1786, %v961_v63   ;;  %994 = vperm.xlu0 %1785, %v960_v0  }
  0x5a   : > { %989 = vperm.xlu1 %1786, %v959_v1   ;;  %984 = vperm.xlu0 %1785, %v958_v2  }
  0x5e   : > { %1009 = vperm.xlu1 %1786, %v963_v3   ;;  %1004 = vperm.xlu0 %1785, %v962_v4  }
  0x62   : > { %1019 = vperm.xlu1 %1786, %v965_v5   ;;  %1014 = vperm.xlu0 %1785, %v964_v6  }
  0x66   : > { %1039 = vperm.xlu1 %1786, %v969_v7   ;;  %1034 = vperm.xlu0 %1785, %v968_v8  }
  0x6a   : > { %1029 = vperm.xlu1 %1786, %v967_v9   ;;  %1024 = vperm.xlu0 %1785, %v966_v10   ;;  %v628_v10 = vld [vmem:[%s2347_s3 + $0x8] sm:$0xff] }
  0x6e   : > { %1049 = vperm.xlu1 %1786, %v971_v11   ;;  %1044 = vperm.xlu0 %1785, %v970_v12   ;;  %v629_v11 = vld [vmem:[%s2347_s3 + $0x10] sm:$0xff]  ;;  %v630_v12 = vld [vmem:[%s2347_s3 + $0x18] sm:$0xff] }
  0x8e   : > { %v358_v14 = vpop.permute.xlu1 %357  ;;  %v348_v15 = vpop.permute.xlu0 %347 }
  0x92   : > { %v363_v16 = vpop.permute.xlu1 %362  ;;  %v353_v17 = vpop.permute.xlu0 %352 }
  0x96   : > { %v373_v18 = vpop.permute.xlu1 %372  ;;  %v368_v19 = vpop.permute.xlu0 %367 }
  0x9d   : > { %v383_v20 = vpop.permute.xlu1 %382  ;;  %v378_v21 = vpop.permute.xlu0 %377 }
  0xa1   : > { %v393_v22 = vpop.permute.xlu1 %392  ;;  %v388_v23 = vpop.permute.xlu0 %387 }
  0xa5   : > { %v403_v24 = vpop.permute.xlu1 %402  ;;  %v398_v25 = vpop.permute.xlu0 %397 }
  0xa9   : > { %v413_v34 = vpop.permute.xlu1 %412  ;;  %v408_v35 = vpop.permute.xlu0 %407 }
  0xad   : > { %v423_v58 = vpop.permute.xlu1 %422  ;;  %v418_v59 = vpop.permute.xlu0 %417 }
  0xfe   : > { %v1553_v26 = vpop.f32.mrb[0].mxu0  ;;  %v1565_v27 = vpop.f32.mrb[0].mxu1 }
  0xff   : > { %v546_v28 = vadd.f32 %v1553_v26, %v353_v17  ;;  %v586_v29 = vadd.f32 %v1565_v27, %v393_v22  ;;  %v540_v30 = vpop.f32.mrb[1].mxu0  ;;  %v580_v31 = vpop.f32.mrb[1].mxu1  ;;  %v635_v17 = vld [vmem:[%s2347_s3 + $0x40] sm:$0xff]  ;;  %v640_v22 = vld [vmem:[%s2347_s3 + $0x68] sm:$0xff] }
 0x100   : > { %v541_v32 = vadd.f32 %v540_v30, %v348_v15  ;;  %v581_v33 = vadd.f32 %v580_v31, %v388_v23  ;;  %v633_v15 = vld [vmem:[%s2347_s3 + $0x30] sm:$0xff]  ;;  %v667_v26 = vpop.permute.xlu1 %666  ;;  %v662_v27 = vpop.permute.xlu0 %661 }
 0x101   : > { %v641_v23 = vld [vmem:[%s2347_s3 + $0x70] sm:$0xff] }
 0x102   : > { %v619_v36 = vmax.f32 %v541_v32, %v546_v28  ;;  %v623_v37 = vmax.f32 %v581_v33, %v586_v29  ;;  %v1556_v38 = vpop.f32.mrb[2].mxu0  ;;  %v1568_v39 = vpop.f32.mrb[2].mxu1 }
 0x103   : > { %v556_v40 = vadd.f32 %v1556_v38, %v363_v16  ;;  %v596_v41 = vadd.f32 %v1568_v39, %v403_v24  ;;  %v550_v42 = vpop.f32.mrb[3].mxu0  ;;  %v590_v43 = vpop.f32.mrb[3].mxu1  ;;  %v634_v16 = vld [vmem:[%s2347_s3 + $0x38] sm:$0xff] }
 0x104   : > { %v551_v44 = vadd.f32 %v550_v42, %v358_v14  ;;  %v591_v45 = vadd.f32 %v590_v43, %v398_v25  ;;  %v632_v14 = vld [vmem:[%s2347_s3 + $0x28] sm:$0xff]  ;;  %v642_v24 = vld [vmem:[%s2347_s3 + $0x78] sm:$0xff]  ;;  %v940_v25 = vld [vmem:[%s2349_s5] sm:$0xff]  ;;  %v677_v28 = vpop.permute.xlu1 %676  ;;  %v672_v29 = vpop.permute.xlu0 %671 }
 0x105   : > { %1631 = vmatprep.mubr.msk.f32.mxu0 %vm425_vm0, %v940_v25  ;;  %v944_v25 = vld [vmem:[%s2349_s5 + $0x20] sm:$0xff] }
 0x106   : > { %v620_v46 = vmax.f32 %v551_v44, %v556_v40  ;;  %v624_v47 = vmax.f32 %v591_v45, %v596_v41  ;;  %v1559_v48 = vpop.f32.mrb[4].mxu0  ;;  %v1571_v49 = vpop.f32.mrb[4].mxu1 }
 0x107   : > { %v566_v50 = vadd.f32 %v1559_v48, %v373_v18  ;;  %v606_v51 = vadd.f32 %v1571_v49, %v413_v34  ;;  %v560_v52 = vpop.f32.mrb[5].mxu0  ;;  %v600_v53 = vpop.f32.mrb[5].mxu1  ;;  %v636_v18 = vld [vmem:[%s2347_s3 + $0x48] sm:$0xff] }
 0x108   : > { %v561_v54 = vadd.f32 %v560_v52, %v368_v19  ;;  %v601_v55 = vadd.f32 %v600_v53, %v408_v35  ;;  %v1690_v56 = vpack.c.bf16 %v620_v46, %v619_v36  ;;  %v1698_v57 = vpack.c.bf16 %v624_v47, %v623_v37  ;;  %v637_v19 = vld [vmem:[%s2347_s3 + $0x50] sm:$0xff]  ;;  %v687_v30 = vpop.permute.xlu1 %686  ;;  %v682_v31 = vpop.permute.xlu0 %681 }
 0x10a   : > { %v621_v60 = vmax.f32 %v561_v54, %v566_v50  ;;  %v625_v61 = vmax.f32 %v601_v55, %v606_v51  ;;  %v1562_v62 = vpop.f32.mrb[6].mxu0  ;;  %v1574_v63 = vpop.f32.mrb[6].mxu1  ;;  %1691 = vmatprep.subr.bf16.mxu1 %v1690_v56 }
 0x10b   : > { %v576_v0 = vadd.f32 %v1562_v62, %v383_v20  ;;  %v616_v1 = vadd.f32 %v1574_v63, %v423_v58  ;;  %v570_v2 = vpop.f32.mrb[7].mxu0  ;;  %v610_v3 = vpop.f32.mrb[7].mxu1  ;;  %1693 = vmatpush3.bf16.msra.mxu1 %v1690_v56  ;;  %v638_v20 = vld [vmem:[%s2347_s3 + $0x58] sm:$0xff] }
 0x10c   : > { %v571_v4 = vadd.f32 %v570_v2, %v378_v21  ;;  %v611_v5 = vadd.f32 %v610_v3, %v418_v59  ;;  %v639_v21 = vld [vmem:[%s2347_s3 + $0x60] sm:$0xff]  ;;  %v697_v34 = vpop.permute.xlu1 %696  ;;  %v692_v36 = vpop.permute.xlu0 %691 }
 0x10e   : > { %v622_v6 = vmax.f32 %v571_v4, %v576_v0  ;;  %v626_v7 = vmax.f32 %v611_v5, %v616_v1 }
 0x110   : > { %v1694_v8 = vpack.c.bf16 %v622_v6, %v621_v60  ;;  %v1702_v9 = vpack.c.bf16 %v626_v7, %v625_v61  ;;  %v707_v46 = vpop.permute.xlu1 %706  ;;  %v702_v48 = vpop.permute.xlu0 %701 }
 0x112   : > { %1695 = vmatprep.subr.bf16.mxu1 %v1694_v8 }
 0x113   : > { %1697 = vmatpush3.bf16.msra.mxu1 %v1694_v8 }
 0x114   : > { %1699 = vmatprep.subr.bf16.mxu1 %v1698_v57  ;;  %v717_v56 = vpop.permute.xlu1 %716  ;;  %v712_v59 = vpop.permute.xlu0 %711 }
 0x117   : > { %1701 = vmatpush3.bf16.msra.mxu1 %v1698_v57 }
 0x118   : > { %1703 = vmatprep.subr.bf16.mxu1 %v1702_v9  ;;  %v727_v2 = vpop.permute.xlu1 %726  ;;  %v722_v5 = vpop.permute.xlu0 %721 }
 0x11b   : > { %1705 = vmatpush3.bf16.msra.mxu1 %v1702_v9 }
 0x11e   : > { %1592 = vmatmul.mubr.msk.f32.vlgmr.msra.gmra.mrb[8].mxu1 %vm425_vm0, %v628_v10 }
 0x11f   : > { %1594 = vmatprep.mubr.msk.f32.mxu1 %vm425_vm0, %v629_v11  ;;  %v737_v11 = vpop.permute.xlu1 %736 }
 0x122   : > { %1595 = vmatmul.mubr.msk.f32.gmra.mrb[10].mxu1 %vm425_vm0, %v630_v12 }
 0x123   : > { %1597 = vmatprep.mubr.msk.f32.mxu1 %vm425_vm0, %v631_v13  ;;  %v732_v13 = vpop.permute.xlu0 %731 }
 0x126   : > { %1598 = vmatmul.mubr.msk.f32.gmra.mrb[12].mxu1 %vm425_vm0, %v632_v14 }
 0x127   : > { %1600 = vmatprep.mubr.msk.f32.mxu1 %vm425_vm0, %v633_v15 }
 0x12a   : > { %1601 = vmatmul.mubr.msk.f32.gmra.mrb[14].mxu1 %vm425_vm0, %v634_v16 }
 0x12b   : > { %1603 = vmatprep.mubr.msk.f32.mxu1 %vm425_vm0, %v635_v17 }
 0x12e   : > { %1604 = vmatmul.mubr.msk.f32.gmra.mrb[16].mxu1 %vm425_vm0, %v636_v18 }
 0x12f   : > { %1606 = vmatprep.mubr.msk.f32.mxu1 %vm425_vm0, %v637_v19 }
 0x132   : > { %1607 = vmatmul.mubr.msk.f32.gmra.mrb[18].mxu1 %vm425_vm0, %v638_v20 }
 0x133   : > { %1609 = vmatprep.mubr.msk.f32.mxu1 %vm425_vm0, %v639_v21 }
 0x136   : > { %1610 = vmatmul.mubr.msk.f32.gmra.mrb[20].mxu1 %vm425_vm0, %v640_v22  ;;  %v941_v22 = vld [vmem:[%s2349_s5 + $0x8] sm:$0xff] }
 0x137   : > { %1612 = vmatprep.mubr.msk.f32.mxu1 %vm425_vm0, %v641_v23  ;;  %v942_v23 = vld [vmem:[%s2349_s5 + $0x10] sm:$0xff] }
 0x13a   : > { %1613 = vmatmul.mubr.msk.f32.gmra.mrb[22].mxu1 %vm425_vm0, %v642_v24  ;;  %v943_v24 = vld [vmem:[%s2349_s5 + $0x18] sm:$0xff] }
 0x1f1   : > { %v1593_v32 = vpop.f32.mrb[8].mxu1 }
 0x1f2   : > { %v853_v33 = vpop.f32.mrb[9].mxu1  ;;  %v859_v37 = vadd.f32 %v1593_v32, %v667_v26  ;;  %v945_v26 = vld [vmem:[%s2349_s5 + $0x28] sm:$0xff]  ;;  %v951_v32 = vld [vmem:[%s2349_s5 + $0x58] sm:$0xff] }
 0x1f3   : > { %v854_v40 = vadd.f32 %v853_v33, %v662_v27  ;;  %v946_v27 = vld [vmem:[%s2349_s5 + $0x30] sm:$0xff]  ;;  %v952_v33 = vld [vmem:[%s2349_s5 + $0x60] sm:$0xff] }
 0x1f5   : > { %v1596_v35 = vpop.f32.mrb[10].mxu1 }
 0x1f6   : > { %v869_v38 = vadd.f32 %v1596_v35, %v677_v28  ;;  %v863_v39 = vpop.f32.mrb[11].mxu1  ;;  %v947_v28 = vld [vmem:[%s2349_s5 + $0x38] sm:$0xff]  ;;  %v954_v35 = vld [vmem:[%s2349_s5 + $0x70] sm:$0xff] }
 0x1f7   : > { %v864_v41 = vadd.f32 %v863_v39, %v672_v29  ;;  %v948_v29 = vld [vmem:[%s2349_s5 + $0x40] sm:$0xff]  ;;  %v980_v39 = vpop.permute.xlu1 %979 }
 0x1f8   : > { %v933_v42 = vmax.f32 %v859_v37, %v869_v38  ;;  %v1852_v37 = vmov 0.0|0.0   ;;  %v1854_v38 = vmov 0.0  }
 0x1f9   : > { %v932_v43 = vmax.f32 %v854_v40, %v864_v41  ;;  %v1599_v44 = vpop.f32.mrb[12].mxu1  ;;  %1722 = vmatprep.subr.bf16.mxu1 %v1852_v37  ;;  %1671 = vmatprep.mubr.msk.f32.mxu1 %vm1853_vm1, %v1854_v38  ;;  %v975_v40 = vpop.permute.xlu0 %974 }
 0x1fa   : > { %v873_v45 = vpop.f32.mrb[13].mxu1  ;;  %v879_v50 = vadd.f32 %v1599_v44, %v687_v30  ;;  %v949_v30 = vld [vmem:[%s2349_s5 + $0x48] sm:$0xff] }
 0x1fb   : > { %v1706_v47 = vpack.c.bf16 %v933_v42, %v932_v43  ;;  %v874_v53 = vadd.f32 %v873_v45, %v682_v31  ;;  %v950_v31 = vld [vmem:[%s2349_s5 + $0x50] sm:$0xff]  ;;  %v1000_v41 = vpop.permute.xlu1 %999 }
 0x1fd   : > { %v1602_v49 = vpop.f32.mrb[14].mxu1  ;;  %1707 = vmatprep.subr.bf16.mxu0 %v1706_v47  ;;  %v995_v42 = vpop.permute.xlu0 %994 }
 0x1fe   : > { %v889_v51 = vadd.f32 %v1602_v49, %v697_v34  ;;  %v883_v52 = vpop.f32.mrb[15].mxu1  ;;  %1709 = vmatpush3.bf16.msra.mxu0 %v1706_v47  ;;  %v953_v34 = vld [vmem:[%s2349_s5 + $0x68] sm:$0xff] }
 0x1ff   : > { %v884_v54 = vadd.f32 %v883_v52, %v692_v36  ;;  %v955_v36 = vld [vmem:[%s2349_s5 + $0x78] sm:$0xff]  ;;  %v990_v43 = vpop.permute.xlu1 %989 }
 0x200   : > { %v935_v55 = vmax.f32 %v879_v50, %v889_v51 }
 0x201   : > { %v934_v57 = vmax.f32 %v874_v53, %v884_v54  ;;  %v1605_v58 = vpop.f32.mrb[16].mxu1  ;;  %v985_v44 = vpop.permute.xlu0 %984 }
 0x202   : > { %v893_v60 = vpop.f32.mrb[17].mxu1  ;;  %v899_v63 = vadd.f32 %v1605_v58, %v707_v46 }
 0x203   : > { %v1710_v61 = vpack.c.bf16 %v935_v55, %v934_v57  ;;  %v894_v3 = vadd.f32 %v893_v60, %v702_v48  ;;  %v1010_v47 = vpop.permute.xlu1 %1009 }
 0x205   : > { %v1608_v62 = vpop.f32.mrb[18].mxu1  ;;  %1711 = vmatprep.subr.bf16.mxu0 %v1710_v61  ;;  %v1005_v49 = vpop.permute.xlu0 %1004 }
 0x206   : > { %v909_v0 = vadd.f32 %v1608_v62, %v717_v56  ;;  %v903_v1 = vpop.f32.mrb[19].mxu1  ;;  %1713 = vmatpush3.bf16.msra.mxu0 %v1710_v61 }
 0x207   : > { %v904_v4 = vadd.f32 %v903_v1, %v712_v59  ;;  %v1020_v55 = vpop.permute.xlu1 %1019 }
 0x208   : > { %v937_v6 = vmax.f32 %v899_v63, %v909_v0 }
 0x209   : > { %v936_v7 = vmax.f32 %v894_v3, %v904_v4  ;;  %v1611_v8 = vpop.f32.mrb[20].mxu1  ;;  %v1015_v58 = vpop.permute.xlu0 %1014 }
 0x20a   : > { %v913_v9 = vpop.f32.mrb[21].mxu1  ;;  %v919_v14 = vadd.f32 %v1611_v8, %v727_v2 }
 0x20b   : > { %v1714_v10 = vpack.c.bf16 %v937_v6, %v936_v7  ;;  %v914_v17 = vadd.f32 %v913_v9, %v722_v5  ;;  %v1040_v5 = vpop.permute.xlu1 %1039 }
 0x20d   : > { %v1614_v12 = vpop.f32.mrb[22].mxu1  ;;  %1715 = vmatprep.subr.bf16.mxu0 %v1714_v10  ;;  %v1035_v8 = vpop.permute.xlu0 %1034 }
 0x20e   : > { %v929_v15 = vadd.f32 %v1614_v12, %v737_v11  ;;  %v923_v16 = vpop.f32.mrb[23].mxu1  ;;  %1717 = vmatpush3.bf16.msra.mxu0 %v1714_v10 }
 0x20f   : > { %v924_v18 = vadd.f32 %v923_v16, %v732_v13  ;;  %v1030_v13 = vpop.permute.xlu1 %1029 }
 0x210   : > { %v939_v19 = vmax.f32 %v919_v14, %v929_v15 }
 0x211   : > { %v938_v20 = vmax.f32 %v914_v17, %v924_v18  ;;  %v1025_v14 = vpop.permute.xlu0 %1024 }
 0x213   : > { %v1718_v21 = vpack.c.bf16 %v939_v19, %v938_v20 }
 0x215   : > { %1719 = vmatprep.subr.bf16.mxu0 %v1718_v21 }
 0x216   : > { %1721 = vmatpush3.bf16.msra.mxu0 %v1718_v21 }
 0x219   : > { %1632 = vmatmul.mubr.msk.f32.vlgmr.msra.gmra.mrb[8].mxu0 %vm425_vm0, %v941_v22  ;;  %v1050_v22 = vpop.permute.xlu1 %1049 }
 0x21a   : > { %1634 = vmatprep.mubr.msk.f32.mxu0 %vm425_vm0, %v942_v23 }
 0x21d   : > { %1635 = vmatmul.mubr.msk.f32.gmra.mrb[10].mxu0 %vm425_vm0, %v943_v24 }
 0x21e   : > { %1637 = vmatprep.mubr.msk.f32.mxu0 %vm425_vm0, %v944_v25  ;;  %v1045_v25 = vpop.permute.xlu0 %1044 }
 0x221   : > { %1638 = vmatmul.mubr.msk.f32.gmra.mrb[12].mxu0 %vm425_vm0, %v945_v26 }
 0x222   : > { %1640 = vmatprep.mubr.msk.f32.mxu0 %vm425_vm0, %v946_v27 }
 0x225   : > { %1641 = vmatmul.mubr.msk.f32.gmra.mrb[14].mxu0 %vm425_vm0, %v947_v28 }
 0x226   : > { %1643 = vmatprep.mubr.msk.f32.mxu0 %vm425_vm0, %v948_v29 }
 0x229   : > { %1644 = vmatmul.mubr.msk.f32.gmra.mrb[16].mxu0 %vm425_vm0, %v949_v30 }
 0x22a   : > { %1646 = vmatprep.mubr.msk.f32.mxu0 %vm425_vm0, %v950_v31 }
 0x22d   : > { %1647 = vmatmul.mubr.msk.f32.gmra.mrb[18].mxu0 %vm425_vm0, %v951_v32 }
 0x22e   : > { %1649 = vmatprep.mubr.msk.f32.mxu0 %vm425_vm0, %v952_v33 }
 0x231   : > { %1650 = vmatmul.mubr.msk.f32.gmra.mrb[20].mxu0 %vm425_vm0, %v953_v34 }
 0x232   : > { %1652 = vmatprep.mubr.msk.f32.mxu0 %vm425_vm0, %v954_v35  ;;  %v1253_v35 = vld [vmem:[%s2351_s7] sm:$0x1] }
 0x235   : > { %1653 = vmatmul.mubr.msk.f32.gmra.mrb[22].mxu0 %vm425_vm0, %v955_v36 }
 0x2ec   : > { %v1633_v45 = vpop.f32.mrb[8].mxu0 }
 0x2ed   : > { %v1166_v46 = vpop.f32.mrb[9].mxu0  ;;  %v1172_v52 = vadd.f32 %v1633_v45, %v980_v39 }
 0x2ee   : > { %v1167_v56 = vadd.f32 %v1166_v46, %v975_v40 }
 0x2f0   : > { %v1636_v48 = vpop.f32.mrb[10].mxu0 }
 0x2f1   : > { %v1176_v50 = vpop.f32.mrb[11].mxu0  ;;  %v1182_v62 = vadd.f32 %v1636_v48, %v990_v43 }
 0x2f2   : > { %v1177_v1 = vadd.f32 %v1176_v50, %v985_v44 }
 0x2f4   : > { %v1639_v51 = vpop.f32.mrb[12].mxu0 }
 0x2f5   : > { %v1192_v53 = vadd.f32 %v1639_v51, %v1000_v41  ;;  %v1186_v54 = vpop.f32.mrb[13].mxu0 }
 0x2f6   : > { %v1187_v57 = vadd.f32 %v1186_v54, %v995_v42 }
 0x2f7   : > { %v1246_v59 = vmax.f32 %v1172_v52, %v1192_v53 }
 0x2f8   : > { %v1245_v60 = vmax.f32 %v1167_v56, %v1187_v57  ;;  %v1642_v61 = vpop.f32.mrb[14].mxu0 }
 0x2f9   : > { %v1202_v63 = vadd.f32 %v1642_v61, %v1010_v47  ;;  %v1196_v0 = vpop.f32.mrb[15].mxu0 }
 0x2fa   : > { %v1723_v2 = vpack.c.bf16 %v1246_v59, %v1245_v60  ;;  %v1197_v3 = vadd.f32 %v1196_v0, %v1005_v49 }
 0x2fb   : > { %v1248_v4 = vmax.f32 %v1182_v62, %v1202_v63 }
 0x2fc   : > { %v1247_v6 = vmax.f32 %v1177_v1, %v1197_v3  ;;  %v1645_v7 = vpop.f32.mrb[16].mxu0  ;;  %1724 = vmatpush3.bf16.msra.mxu1 %v1723_v2 }
 0x2fd   : > { %v1206_v9 = vpop.f32.mrb[17].mxu0  ;;  %1725 = vmatprep.subr.bf16.mxu1 %v1852_v37  ;;  %v1212_v16 = vadd.f32 %v1645_v7, %v1020_v55 }
 0x2fe   : > { %v1726_v10 = vpack.c.bf16 %v1248_v4, %v1247_v6  ;;  %v1207_v19 = vadd.f32 %v1206_v9, %v1015_v58 }
 0x300   : > { %v1648_v11 = vpop.f32.mrb[18].mxu0  ;;  %1727 = vmatpush3.bf16.msra.mxu1 %v1726_v10 }
 0x301   : > { %v1216_v12 = vpop.f32.mrb[19].mxu0  ;;  %1728 = vmatprep.subr.bf16.mxu1 %v1852_v37  ;;  %v1222_v26 = vadd.f32 %v1648_v11, %v1030_v13 }
 0x302   : > { %v1217_v29 = vadd.f32 %v1216_v12, %v1025_v14 }
 0x304   : > { %v1651_v15 = vpop.f32.mrb[20].mxu0 }
 0x305   : > { %v1232_v17 = vadd.f32 %v1651_v15, %v1040_v5  ;;  %v1226_v18 = vpop.f32.mrb[21].mxu0 }
 0x306   : > { %v1227_v20 = vadd.f32 %v1226_v18, %v1035_v8 }
 0x307   : > { %v1250_v21 = vmax.f32 %v1212_v16, %v1232_v17 }
 0x308   : > { %v1249_v23 = vmax.f32 %v1207_v19, %v1227_v20  ;;  %v1654_v24 = vpop.f32.mrb[22].mxu0 }
 0x309   : > { %v1242_v27 = vadd.f32 %v1654_v24, %v1050_v22  ;;  %v1236_v28 = vpop.f32.mrb[23].mxu0 }
 0x30a   : > { %v1729_v30 = vpack.c.bf16 %v1250_v21, %v1249_v23  ;;  %v1237_v31 = vadd.f32 %v1236_v28, %v1045_v25 }
 0x30b   : > { %v1252_v32 = vmax.f32 %v1222_v26, %v1242_v27 }
 0x30c   : > { %v1251_v33 = vmax.f32 %v1217_v29, %v1237_v31  ;;  %1730 = vmatpush3.bf16.msra.mxu1 %v1729_v30 }
 0x30d   : > { %1731 = vmatprep.subr.bf16.mxu1 %v1852_v37 }
 0x30e   : > { %v1732_v34 = vpack.c.bf16 %v1252_v32, %v1251_v33 }
 0x310   : > { %1733 = vmatpush3.bf16.msra.mxu1 %v1732_v34 }
 0x313   : > { %1672 = vmatmul.mubr.msk.f32.vlgmr.msra.gmra.mrb[24].mxu1 %vm425_vm0, %v1253_v35 }
 0x3e6   : > { %v1323_v36 = vpop.f32.mrb[24].mxu1 }
 0x3e7   : > { %1327 = vst [vmem:[%s298_s23] sm:$0x1] %v1323_v36  ;;  %v1673_v37 = vpop.f32.mrb[25].mxu1 }
 0x3e8   : > { %1800 = shalt.err (!%p1797_p3)
}
 0x3e9   : > { %s1801_s20 = scalar_lea.hbm %s2304_s10, 16  ;;  %s1805_s23 = scalar_lea.hbm %s2352_s8, 32 }
 0x3ea   : > { %p1802_p4 = scmp.ne.s32.totalorder %s2304_s10, %s1801_s20  ;;  %p1806_p9 = scmp.lt.u32.totalorder %s2304_s10, %s2352_s8 }
 0x3eb   : > { %p1807_p10 = scmp.lt.u32.totalorder %s1805_s23, %s1801_s20  ;;  %p1809_p12 = scmp.lt.u32.totalorder %s1801_s20, %s2304_s10 }
 0x3ec   : > { %p1803_p7 = pnand %p1802_p4, %p1939_p5 }
 0x3ed   : > { %p1808_p11 = por %p1807_p10, %p1806_p9 }
 0x3ee   : > { %p1804_p8 = pneg %p1803_p7 }
 0x3ef   : > { %p1810_p13 = por %p1809_p12, %p1808_p11 }
 0x3f1   : > { %p1811_p0 = pnand %p1810_p13, %p1804_p8 }
 0x3f3   : > { %1814 = shalt.err (!%p1811_p0)
}
 0x3f4   : > { %1742 = dma.vmem_to_hbm [thread:$0]  (%p1939_p5), %s2299_s17, 16, %s2304_s10, %s1329_s12  }
 0x3f5 PF: > { %p1748_p1 = scmp.ge.s32.totalorder %s1849_s30, 2  ;;  %s1353_s26 = sand.u32 1, %s1837_s27  }
 0x3f6   : > { %s1354_s13 = scalar_lea.sflag [#allocation3], %s1353_s26 }
 0x3f7   : > { %p1745_p2 = pnand %p1748_p1, %p1943_p6 }
 0x3f9   : > { %1832 = dma.done.wait (!%p1745_p2), %s1354_s13, 16  }
 0x3fa   : > { %1834 = vsyncadd (!%p1745_p2), %s1354_s13, 4294967280  ;;  %p18_p3 = scmp.ge.s32.totalorder %s1926_s11, 4   ;;  %s2355_s27 = smov %s1841_s28 }
 0x3fb   : > { %s2356_s28 = smov %s1845_s29  ;;  %s2357_s29 = smov %s1937_s14 }
 0x3fc   : > { %s2358_s30 = smov %s1926_s11  ;;  %20 = sbr.rel (!%p18_p3) target bundleno = 3 (0x3), region = 87 }
 0x403   :  { %1358 = vsyncpa [#allocation3], 1 }
 0x404   :  { %1360 = vsyncpa [#allocation3 + $0x1], 1 }

</bundles_post_ra>
